<compile_context>
chip_gen: v5e
topology: v5e:2x2
jax: 0.10.0
libtpu: 0.0.40
codegen_flags: <defaults>
</compile_context>

<pallas_src>
import functools

import jax
import jax.numpy as jnp
from jax.experimental import pallas as pl
from jax.experimental.pallas import tpu as pltpu


def _round_up(x, m):
    return (x + m - 1) // m * m


# ----------------------------- Pallas kernels -------------------------------

def conv_stats_kernel(patches_ref, w_ref, conv_ref, sum_ref, sumsq_ref):
    """Per M-tile: GEMM (bf16 operands, f32 acc) + per-channel sum / sumsq.

    patches_ref: (tile_m, K_pad)  bf16
    w_ref:       (K_pad, O_pad)   bf16
    conv_ref:    (tile_m, O_pad)  bf16   conv output tile (HBM spill, half width)
    sum_ref:     (1, O_pad)       f32    resident accumulator across the M grid
    sumsq_ref:   (1, O_pad)       f32    resident accumulator across the M grid
    """
    conv = jnp.dot(patches_ref[...], w_ref[...],
                   preferred_element_type=jnp.float32)          # (tile_m, O_pad)

    # Spill the conv intermediate at half width.
    conv_ref[...] = conv.astype(conv_ref.dtype)

    # Init the resident accumulators on the first M tile.
    @pl.when(pl.program_id(0) == 0)
    def _():
        sum_ref[...] = jnp.zeros_like(sum_ref)
        sumsq_ref[...] = jnp.zeros_like(sumsq_ref)

    # Per-output-channel reductions in f32 (padded M rows / O cols are zero,
    # so they contribute nothing).
    sum_ref[...] += jnp.sum(conv, axis=0, keepdims=True)
    sumsq_ref[...] += jnp.sum(conv * conv, axis=0, keepdims=True)


def bn_apply_kernel(conv_ref, scale_ref, shift_ref, out_ref):
    """out = conv * scale + shift  (BN folded into one FMA per element)."""
    conv = conv_ref[...].astype(jnp.float32)
    out_ref[...] = (conv * scale_ref[...] + shift_ref[...]).astype(out_ref.dtype)


# ------------------------------ JAX wrapper ----------------------------------

def _im2col_nchw(x, kernel_size, stride, padding):
    """x: (N, C, H, W) -> patches (N*Ho*Wo, C*k*k), K ordered (C, ki, kj)."""
    n, c, h, w = x.shape
    k = kernel_size
    xp = jnp.pad(x, ((0, 0), (0, 0), (padding, padding), (padding, padding)))
    ho = (h + 2 * padding - k) // stride + 1
    wo = (w + 2 * padding - k) // stride + 1
    slabs = []
    for i in range(k):
        for j in range(k):
            slabs.append(xp[:, :, i:i + stride * ho:stride, j:j + stride * wo:stride])
    pat = jnp.stack(slabs, axis=0).reshape(k, k, n, c, ho, wo)
    # -> (N, Ho, Wo, C, ki, kj) so flattened K matches weight (O, C, kh, kw).
    pat = pat.transpose(2, 4, 5, 3, 0, 1)
    return pat.reshape(n * ho * wo, c * k * k), ho, wo


def conv_bn_forward(x, conv_weight, bn_gamma, bn_beta, *, stride=1, padding=0,
                    eps=1e-5, tile_m=512):
    """x: (N, C_in, H, W); conv_weight: (C_out, C_in, k, k). Returns NCHW.

    PyTorch training-mode forward of BatchNorm2d(Conv2d(x)), groups=1, bias=False.
    """
    n = x.shape[0]
    c_out, c_in, k, _ = conv_weight.shape

    # im2col on bf16 data (halves patch-matrix HBM traffic vs f32).
    # TODO(synk): for large C_in, replace im2col with k*k shifted (M,C_in)x(C_in,O)
    # accumulated matmuls inside the kernel to kill the 9x read amplification.
    patches, ho, wo = _im2col_nchw(x.astype(jnp.bfloat16), k, stride, padding)
    m, k_dim = patches.shape

    # Pad K and O to 128 (lane-dense output, full MXU rows/cols, legal tiling).
    k_pad = _round_up(k_dim, 128)
    o_pad = _round_up(c_out, 128)

    # M tiling (multiple of 16 for bf16 sublane packing).
    tile_m = _round_up(max(16, min(tile_m, _round_up(m, 16))), 16)
    m_pad = _round_up(m, tile_m)
    num_m = m_pad // tile_m

    patches = jnp.pad(patches, ((0, m_pad - m), (0, k_pad - k_dim)))
    w_km = conv_weight.reshape(c_out, k_dim).T.astype(jnp.bfloat16)     # (K, O)
    w_km = jnp.pad(w_km, ((0, k_pad - k_dim), (0, o_pad - c_out)))

    cparams_reduce = pltpu.CompilerParams(
        dimension_semantics=("arbitrary",),        # stats accumulate across M
        vmem_limit_bytes=32 * 1024 * 1024,         # explicit budget (v7x-safe)
    )
    cparams_parallel = pltpu.CompilerParams(
        dimension_semantics=("parallel",),         # v7x: shard M across 2 TCs
        vmem_limit_bytes=32 * 1024 * 1024,
    )

    # ---- Pass 1: tiled GEMM + per-channel sum / sum-of-squares -------------
    conv_bf16, ch_sum, ch_sumsq = pl.pallas_call(
        conv_stats_kernel,
        out_shape=(
            jax.ShapeDtypeStruct((m_pad, o_pad), jnp.bfloat16),
            jax.ShapeDtypeStruct((1, o_pad), jnp.float32),
            jax.ShapeDtypeStruct((1, o_pad), jnp.float32),
        ),
        grid=(num_m,),
        in_specs=[
            pl.BlockSpec((tile_m, k_pad), lambda i: (i, 0)),
            pl.BlockSpec((k_pad, o_pad), lambda i: (0, 0)),
        ],
        out_specs=(
            pl.BlockSpec((tile_m, o_pad), lambda i: (i, 0)),
            pl.BlockSpec((1, o_pad), lambda i: (0, 0)),
            pl.BlockSpec((1, o_pad), lambda i: (0, 0)),
        ),
        compiler_params=cparams_reduce,
    )(patches, w_km)

    # ---- Tiny per-channel scale/shift (plain XLA, O(128) work) -------------
    mean = ch_sum / m                                     # true M (no padding)
    var = jnp.maximum(ch_sumsq / m - mean * mean, 0.0)    # biased batch variance
    gamma = jnp.pad(bn_gamma.astype(jnp.float32).reshape(1, c_out),
                    ((0, 0), (0, o_pad - c_out)), constant_values=1.0)
    beta = jnp.pad(bn_beta.astype(jnp.float32).reshape(1, c_out),
                   ((0, 0), (0, o_pad - c_out)))
    scale = gamma * jax.lax.rsqrt(var + eps)
    shift = beta - mean * scale

    # ---- Pass 2: normalize + affine (one FMA per element, lane-dense) ------
    out_flat = pl.pallas_call(
        bn_apply_kernel,
        out_shape=jax.ShapeDtypeStruct((m_pad, o_pad), jnp.float32),
        grid=(num_m,),
        in_specs=[
            pl.BlockSpec((tile_m, o_pad), lambda i: (i, 0)),
            pl.BlockSpec((1, o_pad), lambda i: (0, 0)),
            pl.BlockSpec((1, o_pad), lambda i: (0, 0)),
        ],
        out_specs=pl.BlockSpec((tile_m, o_pad), lambda i: (i, 0)),
        compiler_params=cparams_parallel,
    )(conv_bf16, scale, shift)

    # (M, O) -> (N, Ho, Wo, C_out) -> NCHW (module semantics).
    # TODO(synk): keep NHWC for downstream consumers to avoid this transpose.
    out = out_flat[:m, :c_out].reshape(n, ho, wo, c_out)
    return out.transpose(0, 3, 1, 2)


# ------------------------------- reference -----------------------------------

def conv_bn_reference(x, conv_weight, bn_gamma, bn_beta, *, stride, padding,
                      eps=1e-5):
    conv = jax.lax.conv_general_dilated(
        x, conv_weight,
        window_strides=(stride, stride),
        padding=[(padding, padding), (padding, padding)],
        dimension_numbers=("NCHW", "OIHW", "NCHW"))
    mean = conv.mean(axis=(0, 2, 3), keepdims=True)
    var = ((conv - mean) ** 2).mean(axis=(0, 2, 3), keepdims=True)  # biased
    g = bn_gamma.reshape(1, -1, 1, 1)
    b = bn_beta.reshape(1, -1, 1, 1)
    return (conv - mean) * jax.lax.rsqrt(var + eps) * g + b


# --------------------------------- main ---------------------------------------

if __name__ == "__main__":
    # ConvBn(in_channel=4, out_channel=8, kernel_size=3, stride=1, padding=1,
    #        bias=False, groups=1)
    N, C_IN, C_OUT, H, W = 2, 4, 8, 16, 16
    K, STRIDE, PAD = 3, 1, 1

    key = jax.random.PRNGKey(0)
    kx, kw = jax.random.split(key)

    x = jax.random.normal(kx, (N, C_IN, H, W), dtype=jnp.float32)
    conv_weight = 0.1 * jax.random.normal(kw, (C_OUT, C_IN, K, K), dtype=jnp.float32)
    bn_gamma = jnp.ones((C_OUT,), dtype=jnp.float32)   # BatchNorm2d default init
    bn_beta = jnp.zeros((C_OUT,), dtype=jnp.float32)

    # tile_m=256 -> M=512 runs as a 2-step grid (exercises the tiled reduction).
    out = conv_bn_forward(x, conv_weight, bn_gamma, bn_beta,
                          stride=STRIDE, padding=PAD, tile_m=256)
    out = jax.block_until_ready(out)

    # Reference on the same bf16-cast operands the kernel sees (f32 math),
    # so the comparison isolates kernel error (bf16 conv spill ~0.4% rel).
    ref = conv_bn_reference(
        x.astype(jnp.bfloat16).astype(jnp.float32),
        conv_weight.astype(jnp.bfloat16).astype(jnp.float32),
        bn_gamma, bn_beta, stride=STRIDE, padding=PAD)

    assert out.shape == (N, C_OUT, H, W), out.shape
    max_err = float(jnp.max(jnp.abs(out - ref)))
    assert max_err < 2e-2, max_err

    print("KERNEL_OK")
</pallas_src>

<mosaic_0001>
module attributes {stable_mosaic.version = 11 : i64} {
  func.func @conv_stats_kernel(%arg0: i32, %arg1: memref<256x128xbf16, #tpu.memory_space<vmem>>, %arg2: memref<128x128xbf16, #tpu.memory_space<vmem>>, %arg3: memref<256x128xbf16, #tpu.memory_space<vmem>>, %arg4: memref<1x128xf32, #tpu.memory_space<vmem>>, %arg5: memref<1x128xf32, #tpu.memory_space<vmem>>) attributes {dimension_semantics = [#tpu.dimension_semantics<arbitrary>], iteration_bounds = array<i64: 2>, scalar_prefetch = 0 : i64, scratch_operands = 0 : i64, tpu.core_type = #tpu.core_type<tc>, window_params = [{transform_indices = @transform_0, window_bounds = array<i64: 256, 128>}, {pipeline_mode = #tpu.pipeline_mode<synchronous>, transform_indices = @transform_1, window_bounds = array<i64: 128, 128>}, {transform_indices = @transform_2, window_bounds = array<i64: 256, 128>}, {pipeline_mode = #tpu.pipeline_mode<synchronous>, transform_indices = @transform_3, window_bounds = array<i64: 1, 128>}, {pipeline_mode = #tpu.pipeline_mode<synchronous>, transform_indices = @transform_4, window_bounds = array<i64: 1, 128>}]} {
    %c0 = arith.constant 0 : index
    %c0_0 = arith.constant 0 : index
    %0 = vector.load %arg1[%c0, %c0_0] : memref<256x128xbf16, #tpu.memory_space<vmem>>, vector<256x128xbf16>
    %c0_1 = arith.constant 0 : index
    %c0_2 = arith.constant 0 : index
    %1 = vector.load %arg2[%c0_1, %c0_2] : memref<128x128xbf16, #tpu.memory_space<vmem>>, vector<128x128xbf16>
    %cst = arith.constant dense<0.000000e+00> : vector<256x128xf32>
    %2 = tpu.matmul %0, %1, %cst {dimension_numbers = #tpu.dot_dimension_numbers<[1], [0], [0], [1], [0, 0, 1, 1], [], []>} : vector<256x128xbf16>, vector<128x128xbf16>, vector<256x128xf32> -> vector<256x128xf32>
    %3 = arith.truncf %2 : vector<256x128xf32> to vector<256x128xbf16>
    %c0_3 = arith.constant 0 : index
    %c0_4 = arith.constant 0 : index
    %4 = vector.load %arg3[%c0_3, %c0_4] : memref<256x128xbf16, #tpu.memory_space<vmem>>, vector<256x128xbf16>
    tpu.vector_store %arg3[%c0_3, %c0_4], %3 {strides = array<i32>} : memref<256x128xbf16, #tpu.memory_space<vmem>>, vector<256x128xbf16>,
    %c0_i32 = arith.constant 0 : i32
    %5 = arith.cmpi eq, %arg0, %c0_i32 : i32
    %6 = arith.extui %5 : i1 to i32
    %c0_i32_5 = arith.constant 0 : i32
    %7 = arith.cmpi ne, %6, %c0_i32_5 : i32
    scf.if %7 {
      %cst_16 = arith.constant 0.000000e+00 : f32
      %19 = vector.broadcast %cst_16 : f32 to vector<1x128xf32>
      %c0_17 = arith.constant 0 : index
      %c0_18 = arith.constant 0 : index
      %20 = vector.load %arg4[%c0_17, %c0_18] : memref<1x128xf32, #tpu.memory_space<vmem>>, vector<1x128xf32>
      tpu.vector_store %arg4[%c0_17, %c0_18], %19 {strides = array<i32>} : memref<1x128xf32, #tpu.memory_space<vmem>>, vector<1x128xf32>,
      %cst_19 = arith.constant 0.000000e+00 : f32
      %21 = vector.broadcast %cst_19 : f32 to vector<1x128xf32>
      %c0_20 = arith.constant 0 : index
      %c0_21 = arith.constant 0 : index
      %22 = vector.load %arg5[%c0_20, %c0_21] : memref<1x128xf32, #tpu.memory_space<vmem>>, vector<1x128xf32>
      tpu.vector_store %arg5[%c0_20, %c0_21], %21 {strides = array<i32>} : memref<1x128xf32, #tpu.memory_space<vmem>>, vector<1x128xf32>,
    } else {
    }
    %c0_6 = arith.constant 0 : index
    %c0_7 = arith.constant 0 : index
    %8 = vector.load %arg4[%c0_6, %c0_7] : memref<1x128xf32, #tpu.memory_space<vmem>>, vector<1x128xf32>
    %cst_8 = arith.constant dense<0.000000e+00> : vector<128xf32>
    %9 = vector.multi_reduction <add>, %2, %cst_8 [0] : vector<256x128xf32> to vector<128xf32>
    %10 = vector.shape_cast %9 : vector<128xf32> to vector<1x128xf32>
    %11 = arith.addf %8, %10 : vector<1x128xf32>
    %c0_9 = arith.constant 0 : index
    %c0_10 = arith.constant 0 : index
    %12 = vector.load %arg4[%c0_9, %c0_10] : memref<1x128xf32, #tpu.memory_space<vmem>>, vector<1x128xf32>
    tpu.vector_store %arg4[%c0_9, %c0_10], %11 {strides = array<i32>} : memref<1x128xf32, #tpu.memory_space<vmem>>, vector<1x128xf32>,
    %c0_11 = arith.constant 0 : index
    %c0_12 = arith.constant 0 : index
    %13 = vector.load %arg5[%c0_11, %c0_12] : memref<1x128xf32, #tpu.memory_space<vmem>>, vector<1x128xf32>
    %14 = arith.mulf %2, %2 : vector<256x128xf32>
    %cst_13 = arith.constant dense<0.000000e+00> : vector<128xf32>
    %15 = vector.multi_reduction <add>, %14, %cst_13 [0] : vector<256x128xf32> to vector<128xf32>
    %16 = vector.shape_cast %15 : vector<128xf32> to vector<1x128xf32>
    %17 = arith.addf %13, %16 : vector<1x128xf32>
    %c0_14 = arith.constant 0 : index
    %c0_15 = arith.constant 0 : index
    %18 = vector.load %arg5[%c0_14, %c0_15] : memref<1x128xf32, #tpu.memory_space<vmem>>, vector<1x128xf32>
    tpu.vector_store %arg5[%c0_14, %c0_15], %17 {strides = array<i32>} : memref<1x128xf32, #tpu.memory_space<vmem>>, vector<1x128xf32>,
    return
  }
  func.func @transform_0(%arg0: i32) -> (i32, i32) {
    %c0_i32 = arith.constant 0 : i32
    %c0_i32_0 = arith.constant 0 : i32
    return %arg0, %c0_i32 : i32, i32
  }
  func.func @transform_1(%arg0: i32) -> (i32, i32) {
    %c0_i32 = arith.constant 0 : i32
    %c0_i32_0 = arith.constant 0 : i32
    %c0_i32_1 = arith.constant 0 : i32
    return %c0_i32, %c0_i32_0 : i32, i32
  }
  func.func @transform_2(%arg0: i32) -> (i32, i32) {
    %c0_i32 = arith.constant 0 : i32
    %c0_i32_0 = arith.constant 0 : i32
    return %arg0, %c0_i32 : i32, i32
  }
  func.func @transform_3(%arg0: i32) -> (i32, i32) {
    %c0_i32 = arith.constant 0 : i32
    %c0_i32_0 = arith.constant 0 : i32
    %c0_i32_1 = arith.constant 0 : i32
    return %c0_i32, %c0_i32_0 : i32, i32
  }
  func.func @transform_4(%arg0: i32) -> (i32, i32) {
    %c0_i32 = arith.constant 0 : i32
    %c0_i32_0 = arith.constant 0 : i32
    %c0_i32_1 = arith.constant 0 : i32
    return %c0_i32, %c0_i32_0 : i32, i32
  }
}

</mosaic_0001>

<bundles_post_ra>
// kernel: tpu_custom_call.1
= control target key start
LH: loop header
LB: loop body
LE: loop exit
PB: predicated region body
PF: predicated region fallthrough
CT: control target
= control target key end

     0   :  { %10 = vsyncpa [#allocation3], 0  ;;  %s1769_s0 = inlined_call_operand.hbm [shape: bf16[512,128], index: 0, kind: input, shape index: {}]   ;;  %s1770_s1 = inlined_call_operand.hbm [shape: bf16[128,128], index: 1, kind: input, shape index: {}]   ;;  %s1771_s2 = inlined_call_operand.hbm [shape: bf16[512,128], index: 2, kind: output, shape index: {0}]   ;;  %s1772_s3 = inlined_call_operand.hbm [shape: f32[1,128], index: 3, kind: output, shape index: {1}]   ;;  %s1773_s4 = inlined_call_operand.hbm [shape: f32[1,128], index: 4, kind: output, shape index: {2}]  }
   0x1   :  { %12 = vsyncpa [#allocation3 + $0x1], 0 }
   0x2   :  { %13 = vsyncpa [#allocation6], 0 }
   0x3   :  { %14 = vsyncpa [#allocation4], 0 }
   0x4   :  { %16 = vsyncpa [#allocation4 + $0x1], 0 }
   0x5   :  { %17 = vsyncpa [#allocation9], 0  ;;  %s1405_s15 = smov 0   ;;  %s1407_s16 = smov 0  }
   0x6   :  { %s1409_s17 = smov 0   ;;  %s1411_s18 = smov 0  }
   0x7 LB: > { %s1426_s19 = sadd.s32 4294967295, %s1370_s18   ;;  %s842_s20 = sadd.s32 4294967294, %s1370_s18   ;;  %s1370_s18 = sphi %s1411_s18, %s1789_s18   ;;  %s1366_s17 = sphi %s1409_s17, %s1788_s17   ;;  %s1362_s16 = sphi %s1407_s16, %s1787_s16   ;;  %s1358_s15 = sphi %s1405_s15, %s1786_s15  }
   0x8   : > { %p43_p0 = scmp.ne.s32.totalorder %s1362_s16, %s1358_s15  ;;  %p44_p1 = scmp.eq.s32.totalorder %s1426_s19, 0 }
   0x9   : > { %p1774_p2 = scmp.eq.s32.totalorder %s1426_s19, 1  ;;  %p94_p3 = scmp.eq.s32.totalorder %s842_s20, 1 }
   0xa   : > { %p1435_p4 = por %p44_p1, %p43_p0  ;;  %p843_p5 = scmp.ge.s32.totalorder %s1370_s18, 1 }
   0xb   : > { %p1440_p6 = por %p94_p3, %p43_p0  ;;  %p143_p7 = scmp.lt.s32.totalorder %s1370_s18, 3 }
   0xc   : > { %s154_s25 = sshll.u32 %s1770_s1, 4  ;;  %s1372_s27 = smov [#allocation5]   ;;  %s155_s25 = int_to_ptr.hbm [resolvable:$true] %s154_s25 }
   0xd   : > { %p1449_p9 = pnand %p843_p5, %p143_p7  ;;  %s156_s28 = sshll.u32 %s1372_s27, 4  ;;  %s157_s28 = int_to_ptr.vmem [resolvable:$true] %s156_s28 }
   0xe   : > { %s1459_s29 = sadd.s32 1, %s1370_s18   ;;  %s1373_s30 = smov 64  }
   0xf   : > { %p1120_p10 = pneg %p1449_p9  ;;  %s1374_s5 = smov 4  }
  0x10   : > { %s27_s6 = ssub.s32 %s1370_s18, %s1459_s29  ;;  %s30_s7 = sadd.s32 1, %s1366_s17 }
  0x11   : > { %p1121_p11 = pnand %p1120_p10, %p44_p1  ;;  %p28_p13 = scmp.eq.s32.totalorder %s27_s6, 0 }
  0x12   : > { %p37_p0 = scmp.ne.s32.totalorder %s1366_s17, %s1362_s16  ;;  %p38_p3 = scmp.eq.s32.totalorder %s1370_s18, 0 }
  0x13   : > { %1123 = dma.hbm_to_vmem [thread:$0]  (!%p1121_p11), %s155_s25, 1024, %s157_s28, [#allocation6], %s1373_s30, %s1373_s30, %s1374_s5  }
  0x14   : > { %s1471_s8 = scalar_select %p28_p13, %s1366_s17, %s30_s7  }
  0x15   : > { %p1475_p5 = por %p1774_p2, %p37_p0  ;;  %p1133_p7 = scmp.lt.s32.totalorder %s1370_s18, 2 }
  0x16   : > { %s170_s10 = sand.u32 1, %s1366_s17   ;;  %s959_s11 = sshll.u32 %s1370_s18, 7 }
  0x17   : > { %p39_p10 = por %p38_p3, %p37_p0  ;;  %s846_s12 = sshll.u32 %s170_s10, 7 }
  0x18   : > { %s179_s20 = scalar_lea.hbm %s1769_s0, %s959_s11  ;;  %s174_s24 = scalar_lea.vmem [#allocation2], %s846_s12 }
  0x19   : > { %s180_s23 = sshll.u32 %s179_s20, 4  ;;  %s182_s25 = sshll.u32 %s174_s24, 4  ;;  %s181_s23 = int_to_ptr.hbm [resolvable:$true] %s180_s23  ;;  %s183_s25 = int_to_ptr.vmem [resolvable:$true] %s182_s25 }
  0x1a   : > { %p1485_p11 = pnand %p1133_p7, %p39_p10  ;;  %s171_s28 = scalar_lea.sflag [#allocation3], %s170_s10 }
  0x1b   : > { %s1210_s6 = sshra.s32 %s181_s23, 4  ;;  %s1217_s12 = scalar_lea.hbm %s1769_s0, 256  ;;  %s1211_s6 = int_to_ptr.hbm [resolvable:$true] %s1210_s6 }
  0x1c   : > { %s1212_s7 = scalar_lea.hbm %s1211_s6, 128  ;;  %p1214_p0 = pneg %p1485_p11 }
  0x1d   : > { %p1213_p13 = scmp.ne.s32.totalorder %s1211_s6, %s1212_s7  ;;  %p1218_p7 = scmp.lt.s32.totalorder %s1211_s6, %s1769_s0 }
  0x1e   : > { %p1219_p10 = scmp.lt.s32.totalorder %s1217_s12, %s1212_s7 }
  0x1f   : > { %p1215_p3 = pnand %p1214_p0, %p1213_p13 }
  0x20   : > { %p1220_p2 = por %p1219_p10, %p1218_p7 }
  0x21   : > { %p1216_p12 = pneg %p1215_p3 }
  0x23   : > { %p1221_p8 = pnand %p1220_p2, %p1216_p12 }
  0x25   : > { %1224 = shalt.err (!%p1221_p8)
}
  0x26   : > { %1127 = dma.hbm_to_vmem [thread:$0]  (!%p1485_p11), %s181_s23, 2048, %s183_s25, %s171_s28, %s1373_s30, %s1373_s30, %s1374_s5  }
  0x27   : > { %194 = sbr.rel (%p1449_p9) target bundleno = 366 (0x16e), region = 28  ;;  %s1505_s10 = sand.u32 (!%p1449_p9), 1, %s1362_s16  }
  0x28   : > { %s850_s24 = sshll.u32 (!%p1449_p9), %s1505_s10, 7  ;;  %s197_s6 = scalar_lea.sflag (!%p1449_p9), [#allocation3], %s1505_s10 }
  0x29   : > { %s1511_s7 = scalar_lea.vmem (!%p1449_p9), [#allocation2], %s850_s24 }
  0x2c   : > { %1341 = dma.done.wait (%p1435_p4), %s197_s6, 2048  }
  0x2d   : > { %1343 = vsyncadd (%p1435_p4), %s197_s6, 4294965248 }
  0x2e   : > { %1345 = dma.done.wait (%p44_p1), [#allocation6], 1024  }
  0x2f   : > { %1347 = vsyncadd (%p44_p1), [#allocation6], 4294966272  ;;  %v983_v0 = vld [vmem:[#allocation5 + $0x38] sm:$0xff]  ;;  %v982_v1 = vld [vmem:[#allocation5 + $0x30] sm:$0xff]  ;;  %s1555_s21 = scalar_lea.vmem [#allocation7], %s850_s24  ;;  %p1780_p1 = scmp.ne.s32.totalorder %s1426_s19, 0 }
  0x30   : > { %425 = vmatpush.bf16.msra.mxu0 %v983_v0  ;;  %1080 = vmatpush.bf16.msra.mxu1 %v983_v0  ;;  %v981_v2 = vld [vmem:[#allocation5 + $0x28] sm:$0xff]  ;;  %v980_v3 = vld [vmem:[#allocation5 + $0x20] sm:$0xff]  ;;  %v979_v4 = vld [vmem:[#allocation5 + $0x18] sm:$0xff] }
  0x31   : > { %1081 = vmatpush.bf16.msra.mxu2 %v983_v0  ;;  %1082 = vmatpush.bf16.msra.mxu3 %v983_v0  ;;  %v978_v5 = vld [vmem:[#allocation5 + $0x10] sm:$0xff]  ;;  %v977_v6 = vld [vmem:[#allocation5 + $0x8] sm:$0xff]  ;;  %v976_v7 = vld [vmem:[#allocation5] sm:$0xff] }
  0x32   : > { %v960_v8 = vld [vmem:[%s1511_s7] sm:$0xff]  ;;  %v961_v12 = vld [vmem:[%s1511_s7 + $0x8] sm:$0xff]  ;;  %v962_v16 = vld [vmem:[%s1511_s7 + $0x10] sm:$0xff] }
  0x33   : > { %v964_v9 = vld [vmem:[%s1511_s7 + $0x20] sm:$0xff]  ;;  %v965_v13 = vld [vmem:[%s1511_s7 + $0x28] sm:$0xff]  ;;  %v966_v17 = vld [vmem:[%s1511_s7 + $0x30] sm:$0xff] }
  0x34   : > { %426 = vmatpush.bf16.msra.mxu0 %v982_v1  ;;  %1083 = vmatpush.bf16.msra.mxu1 %v982_v1  ;;  %v968_v10 = vld [vmem:[%s1511_s7 + $0x40] sm:$0xff]  ;;  %v969_v14 = vld [vmem:[%s1511_s7 + $0x48] sm:$0xff]  ;;  %v970_v18 = vld [vmem:[%s1511_s7 + $0x50] sm:$0xff] }
  0x35   : > { %1084 = vmatpush.bf16.msra.mxu2 %v982_v1  ;;  %1085 = vmatpush.bf16.msra.mxu3 %v982_v1  ;;  %v972_v11 = vld [vmem:[%s1511_s7 + $0x60] sm:$0xff]  ;;  %v973_v15 = vld [vmem:[%s1511_s7 + $0x68] sm:$0xff]  ;;  %v974_v19 = vld [vmem:[%s1511_s7 + $0x70] sm:$0xff] }
  0x36   : > { %v963_v20 = vld [vmem:[%s1511_s7 + $0x18] sm:$0xff] }
  0x37   : > { %v967_v21 = vld [vmem:[%s1511_s7 + $0x38] sm:$0xff] }
  0x38   : > { %427 = vmatpush.bf16.msra.mxu0 %v981_v2  ;;  %1086 = vmatpush.bf16.msra.mxu1 %v981_v2  ;;  %v971_v22 = vld [vmem:[%s1511_s7 + $0x58] sm:$0xff] }
  0x39   : > { %1087 = vmatpush.bf16.msra.mxu2 %v981_v2  ;;  %1088 = vmatpush.bf16.msra.mxu3 %v981_v2  ;;  %v975_v23 = vld [vmem:[%s1511_s7 + $0x78] sm:$0xff] }
  0x3c   : > { %428 = vmatpush.bf16.msra.mxu0 %v980_v3  ;;  %1089 = vmatpush.bf16.msra.mxu1 %v980_v3 }
  0x3d   : > { %1090 = vmatpush.bf16.msra.mxu2 %v980_v3  ;;  %1091 = vmatpush.bf16.msra.mxu3 %v980_v3 }
  0x40   : > { %429 = vmatpush.bf16.msra.mxu0 %v979_v4  ;;  %1092 = vmatpush.bf16.msra.mxu1 %v979_v4 }
  0x41   : > { %1093 = vmatpush.bf16.msra.mxu2 %v979_v4  ;;  %1094 = vmatpush.bf16.msra.mxu3 %v979_v4 }
  0x44   : > { %430 = vmatpush.bf16.msra.mxu0 %v978_v5  ;;  %1095 = vmatpush.bf16.msra.mxu1 %v978_v5 }
  0x45   : > { %1096 = vmatpush.bf16.msra.mxu2 %v978_v5  ;;  %1097 = vmatpush.bf16.msra.mxu3 %v978_v5 }
  0x48   : > { %431 = vmatpush.bf16.msra.mxu0 %v977_v6  ;;  %1098 = vmatpush.bf16.msra.mxu1 %v977_v6 }
  0x49   : > { %1099 = vmatpush.bf16.msra.mxu2 %v977_v6  ;;  %1100 = vmatpush.bf16.msra.mxu3 %v977_v6 }
  0x4c   : > { %432 = vmatpush.bf16.msra.mxu0 %v976_v7  ;;  %1101 = vmatpush.bf16.msra.mxu1 %v976_v7 }
  0x4d   : > { %1102 = vmatpush.bf16.msra.mxu2 %v976_v7  ;;  %1103 = vmatpush.bf16.msra.mxu3 %v976_v7 }
  0x4f   : > { %433 = vmatmul.bf16.vlgmr.msra.gmra.mxu0 %v960_v8  ;;  %453 = vmatmul.bf16.vlgmr.msra.gmra.mxu1 %v964_v9 }
  0x50   : > { %473 = vmatmul.bf16.vlgmr.msra.gmra.mxu2 %v968_v10  ;;  %493 = vmatmul.bf16.vlgmr.msra.gmra.mxu3 %v972_v11 }
  0x5f   : > { %438 = vmatmul.bf16.gmra.mxu0 %v961_v12  ;;  %458 = vmatmul.bf16.gmra.mxu1 %v965_v13 }
  0x60   : > { %478 = vmatmul.bf16.gmra.mxu2 %v969_v14  ;;  %498 = vmatmul.bf16.gmra.mxu3 %v973_v15 }
  0x6f   : > { %443 = vmatmul.bf16.gmra.mxu0 %v962_v16  ;;  %463 = vmatmul.bf16.gmra.mxu1 %v966_v17 }
  0x70   : > { %483 = vmatmul.bf16.gmra.mxu2 %v970_v18  ;;  %503 = vmatmul.bf16.gmra.mxu3 %v974_v19 }
  0x7f   : > { %448 = vmatmul.bf16.gmra.mxu0 %v963_v20  ;;  %468 = vmatmul.bf16.gmra.mxu1 %v967_v21 }
  0x80   : > { %488 = vmatmul.bf16.gmra.mxu2 %v971_v22  ;;  %508 = vmatmul.bf16.gmra.mxu3 %v975_v23 }
  0xcc   : > { %v1537_v24 = vpop.f32.mrf.mxu0  ;;  %v1539_v25 = vpop.f32.mrf.mxu1 }
  0xd3   : > { %v1541_v26 = vpop.f32.mrf.mxu2  ;;  %v1543_v27 = vpop.f32.mrf.mxu3 }
  0xd4   : > { %v1545_v28 = vpop.f32.mrf.mxu0  ;;  %v1547_v29 = vpop.f32.mrf.mxu1 }
  0xd5   : > { %v988_v30 = vpack.c.bf16 %v1545_v28, %v1537_v24  ;;  %v1008_v31 = vpack.c.bf16 %v1547_v29, %v1539_v25 }
  0xd7   : > { %989 = vst [vmem:[%s1555_s21] sm:$0xff] %v988_v30  }
  0xd8   : > { %1068 = vst [vmem:[%s1555_s21 + $0x20] sm:$0xff] %v1008_v31  }
  0xdb   : > { %v1559_v32 = vpop.f32.mrf.mxu2  ;;  %v1561_v33 = vpop.f32.mrf.mxu3 }
  0xdc   : > { %v1028_v34 = vpack.c.bf16 %v1559_v32, %v1541_v26  ;;  %v1048_v35 = vpack.c.bf16 %v1561_v33, %v1543_v27  ;;  %v439_v36 = vpop.f32.mrf.mxu0  ;;  %v1567_v37 = vpop.f32.mrf.mxu1 }
  0xde   : > { %1072 = vst [vmem:[%s1555_s21 + $0x40] sm:$0xff] %v1028_v34  }
  0xdf   : > { %1076 = vst [vmem:[%s1555_s21 + $0x60] sm:$0xff] %v1048_v35  }
  0xe3   : > { %v1571_v38 = vpop.f32.mrf.mxu2  ;;  %v1573_v39 = vpop.f32.mrf.mxu3 }
  0xe4   : > { %v441_v40 = vpop.f32.mrf.mxu0  ;;  %v1575_v41 = vpop.f32.mrf.mxu1 }
  0xe5   : > { %v993_v42 = vpack.c.bf16 %v441_v40, %v439_v36  ;;  %v1013_v43 = vpack.c.bf16 %v1575_v41, %v1567_v37 }
  0xe7   : > { %1065 = vst [vmem:[%s1555_s21 + $0x8] sm:$0xff] %v993_v42  }
  0xe8   : > { %1069 = vst [vmem:[%s1555_s21 + $0x28] sm:$0xff] %v1013_v43  }
  0xeb   : > { %v1581_v44 = vpop.f32.mrf.mxu2  ;;  %v1583_v45 = vpop.f32.mrf.mxu3 }
  0xec   : > { %v1033_v46 = vpack.c.bf16 %v1581_v44, %v1571_v38  ;;  %v1053_v47 = vpack.c.bf16 %v1583_v45, %v1573_v39  ;;  %v444_v48 = vpop.f32.mrf.mxu0  ;;  %v1589_v49 = vpop.f32.mrf.mxu1 }
  0xee   : > { %1073 = vst [vmem:[%s1555_s21 + $0x48] sm:$0xff] %v1033_v46  }
  0xef   : > { %1077 = vst [vmem:[%s1555_s21 + $0x68] sm:$0xff] %v1053_v47  }
  0xf3   : > { %v1593_v50 = vpop.f32.mrf.mxu2  ;;  %v1595_v51 = vpop.f32.mrf.mxu3 }
  0xf4   : > { %v1597_v52 = vpop.f32.mrf.mxu0  ;;  %v1599_v53 = vpop.f32.mrf.mxu1 }
  0xf5   : > { %v998_v54 = vpack.c.bf16 %v1597_v52, %v444_v48  ;;  %v1018_v55 = vpack.c.bf16 %v1599_v53, %v1589_v49 }
  0xf7   : > { %1066 = vst [vmem:[%s1555_s21 + $0x10] sm:$0xff] %v998_v54  }
  0xf8   : > { %1070 = vst [vmem:[%s1555_s21 + $0x30] sm:$0xff] %v1018_v55  }
  0xfb   : > { %v1606_v56 = vpop.f32.mrf.mxu2  ;;  %v1608_v57 = vpop.f32.mrf.mxu3 }
  0xfc   : > { %v1038_v58 = vpack.c.bf16 %v1606_v56, %v1593_v50  ;;  %v1058_v59 = vpack.c.bf16 %v1608_v57, %v1595_v51  ;;  %v449_v60 = vpop.f32.mrf.mxu0  ;;  %v1614_v61 = vpop.f32.mrf.mxu1 }
  0xfe   : > { %1074 = vst [vmem:[%s1555_s21 + $0x50] sm:$0xff] %v1038_v58  }
  0xff   : > { %1078 = vst [vmem:[%s1555_s21 + $0x70] sm:$0xff] %v1058_v59  }
 0x103   : > { %v1618_v62 = vpop.f32.mrf.mxu2  ;;  %v1620_v63 = vpop.f32.mrf.mxu3 }
 0x104   : > { %v451_v0 = vpop.f32.mrf.mxu0  ;;  %v1622_v1 = vpop.f32.mrf.mxu1 }
 0x105   : > { %v1003_v2 = vpack.c.bf16 %v451_v0, %v449_v60  ;;  %v1023_v3 = vpack.c.bf16 %v1622_v1, %v1614_v61 }
 0x107   : > { %1067 = vst [vmem:[%s1555_s21 + $0x18] sm:$0xff] %v1003_v2  }
 0x108   : > { %1071 = vst [vmem:[%s1555_s21 + $0x38] sm:$0xff] %v1023_v3  }
 0x10b   : > { %v1628_v4 = vpop.f32.mrf.mxu2  ;;  %v1630_v5 = vpop.f32.mrf.mxu3  ;;  %581 = sbr.rel (%p1780_p1) target bundleno = 275 (0x113), region = 40 }
 0x10c   : > { %v1043_v6 = vpack.c.bf16 %v1628_v4, %v1618_v62  ;;  %v1063_v7 = vpack.c.bf16 %v1630_v5, %v1620_v63 }
 0x10e   : > { %1075 = vst [vmem:[%s1555_s21 + $0x58] sm:$0xff] %v1043_v6  }
 0x10f   : > { %1079 = vst [vmem:[%s1555_s21 + $0x78] sm:$0xff] %v1063_v7  }
 0x110   : > { %v1375_v8 = vmov 0.0  }
 0x111   : > { %582 = vst [vmem:[#allocation8] sm:$0x1] %v1375_v8 }
 0x112   : > { %583 = vst [vmem:[#allocation10] sm:$0x1] %v1375_v8 }
 0x113 PF: > { %v585_v9 = vadd.f32 %v1545_v28, %v1537_v24  ;;  %v625_v10 = vmul.f32 %v1537_v24, %v1537_v24  ;;  %v626_v11 = vmul.f32 %v1545_v28, %v1545_v28  ;;  %v627_v13 = vmul.f32 %v439_v36, %v439_v36  ;;  %s984_s26 = sshll.u32 %s1426_s19, 7  ;;  %s709_s25 = sshll.u32 %s1555_s21, 4  ;;  %s710_s25 = int_to_ptr.vmem [resolvable:$true] %s709_s25 }
 0x114   : > { %s708_s23 = scalar_lea.hbm %s1771_s2, %s984_s26  ;;  %v628_v15 = vmul.f32 %v441_v40, %v441_v40  ;;  %v629_v18 = vmul.f32 %v444_v48, %v444_v48  ;;  %s697_s28 = scalar_lea.sflag [#allocation4], %s1505_s10 }
 0x115   : > { %v586_v12 = vadd.f32 %v585_v9, %v439_v36  ;;  %v657_v16 = vadd.f32 %v626_v11, %v625_v10  ;;  %s711_s27 = sshll.u32 %s708_s23, 4  ;;  %s1260_s20 = scalar_lea.hbm %s1771_s2, 256  ;;  %s712_s27 = int_to_ptr.hbm [resolvable:$true] %s711_s27 }
 0x116   : > { %s1254_s11 = sshra.s32 %s712_s27, 4  ;;  %s1255_s11 = int_to_ptr.hbm [resolvable:$true] %s1254_s11 }
 0x117   : > { %v587_v14 = vadd.f32 %v586_v12, %v441_v40  ;;  %v658_v19 = vadd.f32 %v657_v16, %v627_v13  ;;  %s1256_s13 = scalar_lea.hbm %s1255_s11, 128  ;;  %p1261_p9 = scmp.lt.s32.totalorder %s1255_s11, %s1771_s2 }
 0x118   : > { %p1257_p2 = scmp.ne.s32.totalorder %s1255_s11, %s1256_s13  ;;  %p1262_p12 = scmp.lt.s32.totalorder %s1260_s20, %s1256_s13 }
 0x119   : > { %v588_v17 = vadd.f32 %v587_v14, %v444_v48 }
 0x11a   : > { %p1258_p4 = pnand %p1257_p2, %p1475_p5  ;;  %p1263_p11 = por %p1262_p12, %p1261_p9 }
 0x11b   : > { %v589_v20 = vadd.f32 %v588_v17, %v1597_v52 }
 0x11c   : > { %p1259_p8 = pneg %p1258_p4 }
 0x11e   : > { %p1264_p13 = pnand %p1263_p11, %p1259_p8 }
 0x120   : > { %1267 = shalt.err (!%p1264_p13)
}
 0x121   : > { %s1376_s10 = smov 64   ;;  %s1377_s7 = smov 4   ;;  %v630_v21 = vmul.f32 %v1597_v52, %v1597_v52  ;;  %v659_v22 = vadd.f32 %v658_v19, %v628_v15  ;;  %v590_v23 = vadd.f32 %v589_v20, %v449_v60  ;;  %v631_v24 = vmul.f32 %v449_v60, %v449_v60 }
 0x122   : > { %1110 = dma.vmem_to_hbm [thread:$0]  (%p1475_p5), %s710_s25, 2048, %s712_s27, %s697_s28, %s1376_s10, %s1376_s10, %s1377_s7   ;;  %v632_v31 = vmul.f32 %v451_v0, %v451_v0  ;;  %v633_v36 = vmul.f32 %v1539_v25, %v1539_v25  ;;  %v634_v43 = vmul.f32 %v1547_v29, %v1547_v29  ;;  %v635_v48 = vmul.f32 %v1567_v37, %v1567_v37 }
 0x123   : > { %v660_v28 = vadd.f32 %v659_v22, %v629_v18  ;;  %v591_v30 = vadd.f32 %v590_v23, %v451_v0  ;;  %v636_v55 = vmul.f32 %v1575_v41, %v1575_v41  ;;  %v637_v59 = vmul.f32 %v1589_v49, %v1589_v49  ;;  %s1378_s9 = smov [#allocation8]   ;;  %s726_s5 = sshll.u32 %s1772_s3, 4  ;;  %s727_s5 = int_to_ptr.hbm [resolvable:$true] %s726_s5 }
 0x124   : > { %v638_v0 = vmul.f32 %v1599_v53, %v1599_v53  ;;  %v639_v3 = vmul.f32 %v1614_v61, %v1614_v61  ;;  %v640_v7 = vmul.f32 %v1622_v1, %v1622_v1  ;;  %v641_v9 = vmul.f32 %v1541_v26, %v1541_v26  ;;  %s724_s21 = sshll.u32 %s1378_s9, 4  ;;  %s1379_s23 = smov [#allocation10]   ;;  %s725_s21 = int_to_ptr.vmem [resolvable:$true] %s724_s21 }
 0x125   : > { %v661_v34 = vadd.f32 %v660_v28, %v630_v21  ;;  %v592_v35 = vadd.f32 %v591_v30, %v1539_v25  ;;  %v642_v11 = vmul.f32 %v1559_v32, %v1559_v32  ;;  %v643_v13 = vmul.f32 %v1571_v38, %v1571_v38  ;;  %s736_s25 = sshll.u32 %s1379_s23, 4  ;;  %s738_s11 = sshll.u32 %s1773_s4, 4  ;;  %s737_s25 = int_to_ptr.vmem [resolvable:$true] %s736_s25  ;;  %s739_s11 = int_to_ptr.hbm [resolvable:$true] %s738_s11 }
 0x126   : > { %v644_v15 = vmul.f32 %v1581_v44, %v1581_v44  ;;  %v645_v17 = vmul.f32 %v1593_v50, %v1593_v50  ;;  %v646_v19 = vmul.f32 %v1606_v56, %v1606_v56  ;;  %v647_v21 = vmul.f32 %v1618_v62, %v1618_v62  ;;  %p1781_p5 = scmp.eq.s32.totalorder %s1426_s19, 1 }
 0x127   : > { %v662_v40 = vadd.f32 %v661_v34, %v631_v24  ;;  %v593_v42 = vadd.f32 %v592_v35, %v1547_v29  ;;  %v648_v23 = vmul.f32 %v1628_v4, %v1628_v4  ;;  %v649_v28 = vmul.f32 %v1543_v27, %v1543_v27 }
 0x128   : > { %v651_v35 = vmul.f32 %v1573_v39, %v1573_v39  ;;  %p1782_p0 = pmov %p1781_p5 }
 0x129   : > { %v663_v46 = vadd.f32 %v662_v40, %v632_v31  ;;  %v594_v47 = vadd.f32 %v593_v42, %v1567_v37  ;;  %v650_v31 = vmul.f32 %v1561_v33, %v1561_v33  ;;  %v652_v40 = vmul.f32 %v1583_v45, %v1583_v45 }
 0x12a   : > { %p1783_p3 = pmov %p1782_p0 }
 0x12b   : > { %v664_v52 = vadd.f32 %v663_v46, %v633_v36  ;;  %v595_v54 = vadd.f32 %v594_v47, %v1575_v41  ;;  %v654_v47 = vmul.f32 %v1608_v57, %v1608_v57 }
 0x12d   : > { %v665_v58 = vadd.f32 %v664_v52, %v634_v43  ;;  %v596_v25 = vadd.f32 %v595_v54, %v1589_v49  ;;  %v653_v43 = vmul.f32 %v1595_v51, %v1595_v51  ;;  %v655_v52 = vmul.f32 %v1620_v63, %v1620_v63 }
 0x12f   : > { %v666_v60 = vadd.f32 %v665_v58, %v635_v48  ;;  %v597_v29 = vadd.f32 %v596_v25, %v1599_v53 }
 0x131   : > { %v667_v2 = vadd.f32 %v666_v60, %v636_v55  ;;  %v598_v37 = vadd.f32 %v597_v29, %v1614_v61  ;;  %v656_v55 = vmul.f32 %v1630_v5, %v1630_v5 }
 0x133   : > { %v668_v6 = vadd.f32 %v667_v2, %v637_v59  ;;  %v599_v41 = vadd.f32 %v598_v37, %v1622_v1 }
 0x135   : > { %v669_v8 = vadd.f32 %v668_v6, %v638_v0  ;;  %v600_v49 = vadd.f32 %v599_v41, %v1541_v26 }
 0x137   : > { %v670_v10 = vadd.f32 %v669_v8, %v639_v3  ;;  %v601_v53 = vadd.f32 %v600_v49, %v1559_v32  ;;  %v584_v3 = vld [vmem:[#allocation8] sm:$0x1]  ;;  %v624_v8 = vld [vmem:[#allocation10] sm:$0x1] }
 0x139   : > { %v671_v12 = vadd.f32 %v670_v10, %v640_v7  ;;  %v602_v61 = vadd.f32 %v601_v53, %v1571_v38 }
 0x13b   : > { %v672_v14 = vadd.f32 %v671_v12, %v641_v9  ;;  %v603_v1 = vadd.f32 %v602_v61, %v1581_v44 }
 0x13d   : > { %v673_v16 = vadd.f32 %v672_v14, %v642_v11  ;;  %v604_v26 = vadd.f32 %v603_v1, %v1593_v50 }
 0x13f   : > { %v674_v18 = vadd.f32 %v673_v16, %v643_v13  ;;  %v605_v32 = vadd.f32 %v604_v26, %v1606_v56 }
 0x141   : > { %v675_v20 = vadd.f32 %v674_v18, %v644_v15  ;;  %v606_v38 = vadd.f32 %v605_v32, %v1618_v62 }
 0x143   : > { %v676_v22 = vadd.f32 %v675_v20, %v645_v17  ;;  %v607_v44 = vadd.f32 %v606_v38, %v1628_v4 }
 0x145   : > { %v677_v24 = vadd.f32 %v676_v22, %v646_v19  ;;  %v608_v50 = vadd.f32 %v607_v44, %v1543_v27 }
 0x147   : > { %v678_v30 = vadd.f32 %v677_v24, %v647_v21  ;;  %v609_v56 = vadd.f32 %v608_v50, %v1561_v33 }
 0x149   : > { %v679_v34 = vadd.f32 %v678_v30, %v648_v23  ;;  %v610_v62 = vadd.f32 %v609_v56, %v1573_v39 }
 0x14b   : > { %v680_v36 = vadd.f32 %v679_v34, %v649_v28  ;;  %v611_v4 = vadd.f32 %v610_v62, %v1583_v45 }
 0x14d   : > { %v681_v42 = vadd.f32 %v680_v36, %v650_v31  ;;  %v612_v27 = vadd.f32 %v611_v4, %v1595_v51 }
 0x14f   : > { %v682_v46 = vadd.f32 %v681_v42, %v651_v35  ;;  %v613_v33 = vadd.f32 %v612_v27, %v1608_v57 }
 0x151   : > { %v683_v48 = vadd.f32 %v682_v46, %v652_v40  ;;  %v614_v39 = vadd.f32 %v613_v33, %v1620_v63 }
 0x153   : > { %v684_v54 = vadd.f32 %v683_v48, %v653_v43  ;;  %v615_v45 = vadd.f32 %v614_v39, %v1630_v5 }
 0x155   : > { %v685_v58 = vadd.f32 %v684_v54, %v654_v47  ;;  %v616_v51 = vrot.slane %v615_v45, 4 }
 0x157   : > { %v686_v25 = vadd.f32 %v685_v58, %v655_v52  ;;  %v617_v59 = vadd.f32 %v616_v51, %v615_v45 }
 0x159   : > { %v687_v60 = vadd.f32 %v686_v25, %v656_v55  ;;  %v618_v29 = vrot.slane %v617_v59, 2 }
 0x15b   : > { %v688_v0 = vrot.slane %v687_v60, 4  ;;  %v619_v57 = vadd.f32 %v618_v29, %v617_v59 }
 0x15d   : > { %v689_v2 = vadd.f32 %v688_v0, %v687_v60  ;;  %v620_v37 = vrot.slane %v619_v57, 1 }
 0x15f   : > { %v690_v6 = vrot.slane %v689_v2, 2  ;;  %v621_v63 = vadd.f32 %v620_v37, %v619_v57 }
 0x161   : > { %v691_v5 = vadd.f32 %v690_v6, %v689_v2  ;;  %v622_v41 = vadd.f32 %v621_v63, %v584_v3 }
 0x163   : > { %v692_v7 = vrot.slane %v691_v5, 1  ;;  %623 = vst [vmem:[#allocation8] sm:$0x1] %v622_v41 }
 0x164   : > { %1112 = dma.vmem_to_hbm [thread:$0]  (%p1781_p5), %s725_s21, 16, %s727_s5, [#allocation9]  }
 0x165   : > { %v693_v49 = vadd.f32 %v692_v7, %v691_v5 }
 0x167   : > { %v694_v9 = vadd.f32 %v693_v49, %v624_v8 }
 0x169   : > { %695 = vst [vmem:[#allocation10] sm:$0x1] %v694_v9 }
 0x16a   : > { %1114 = dma.vmem_to_hbm [thread:$0]  (%p1782_p0), %s737_s25, 16, %s739_s11, [#allocation9]  }
 0x16b   : > { %1349 = dma.done.wait (%p1783_p3), [#allocation9], 32   ;;  %p1784_p7 = pmov %p1782_p0 }
 0x16d   : > { %1351 = vsyncadd (%p1784_p7), [#allocation9], 4294967264 }
 0x16e PF: > { %s760_s13 = sand.u32 1, %s1358_s15   ;;  %p1785_p10 = scmp.ge.s32.totalorder %s1370_s18, 2 }
 0x16f   : > { %s761_s12 = scalar_lea.sflag [#allocation4], %s760_s13 }
 0x170   : > { %p1129_p1 = pnand %p1785_p10, %p1440_p6 }
 0x172   : > { %p1130_p2 = pneg %p1129_p1 }
 0x174   : > { %1353 = dma.done.wait (%p1130_p2), %s761_s12, 2048  }
 0x175   : > { %1355 = vsyncadd (%p1130_p2), %s761_s12, 4294965248  ;;  %p20_p4 = scmp.ge.s32.totalorder %s1459_s29, 4   ;;  %s1786_s15 = smov %s1362_s16 }
 0x176   : > { %s1787_s16 = smov %s1366_s17  ;;  %s1788_s17 = smov %s1471_s8 }
 0x177   : > { %s1789_s18 = smov %s1459_s29  ;;  %22 = sbr.rel (!%p20_p4) target bundleno = 7 (0x7), region = 97 }
 0x17c   :  { %767 = vsyncpa [#allocation3], 1 }
 0x17d   :  { %769 = vsyncpa [#allocation3 + $0x1], 1 }
 0x17e   :  { %770 = vsyncpa [#allocation6], 1 }
 0x17f   :  { %771 = vsyncpa [#allocation4], 1 }
 0x180   :  { %773 = vsyncpa [#allocation4 + $0x1], 1 }
 0x181   :  { %774 = vsyncpa [#allocation9], 1 }

</bundles_post_ra>
